<compile_context>
chip_gen: v5e
topology: v5e:2x2
jax: 0.10.0
libtpu: 0.0.40
codegen_flags: <defaults>
</compile_context>

<pallas_src>
import jax
import jax.numpy as jnp
from jax import lax
from jax.experimental import pallas as pl
from jax.experimental.pallas import tpu as pltpu


def gating_kernel(w_ref, b_ref, x_ref, o_ref):
    # w: [E, D], b: [E, 1], x: [TB, D]  ->  o: [E, TB]  (softmax over E / sublane axis).
    w = w_ref[...]
    b = b_ref[...]
    x = x_ref[...]
    # Contract the shared D axis; the MXU eats the trans_b for free, so x never
    # needs a wrapper-side transpose through HBM.
    logits = lax.dot_general(
        w, x, (((1,), (1,)), ((), ())),
        preferred_element_type=jnp.float32) + b                      # [E, TB]
    m = jnp.max(logits, axis=0, keepdims=True)                       # [1, TB] (XLU)
    e = jnp.exp(logits - m)                                          # EUP
    denom = jnp.sum(e, axis=0, keepdims=True)                        # [1, TB] (XLU)
    # Exact division: guarantees per-row probabilities sum to 1 to f32 precision.
    o_ref[...] = (e / denom).astype(o_ref.dtype)


def init_gating_params(weight, bias):
    """One-time parameter layout: weight stays in PyTorch [E, D]; bias -> [E, 1]."""
    return weight, bias.reshape(-1, 1)


def gating_network(x, weight_ed, bias_e1, *, block_b=4096, transpose_output=True):
    """x: [B, D] f32, weight_ed: [E, D], bias_e1: [E, 1] -> softmax probs.

    Returns [B, E] (matching nn.Softmax(dim=1)) by default; pass
    transpose_output=False to get the kernel-native lane-dense [E, B] layout
    (preferred when feeding a fused top-k / dispatch consumer).
    """
    B, D = x.shape
    E = weight_ed.shape[0]
    block_b = max(128, (block_b // 128) * 128)  # keep the lane tile 128-aligned

    if B <= block_b:
        # Small/medium batch: single whole-array block in VMEM, no grid machinery.
        out_eb = pl.pallas_call(
            gating_kernel,
            out_shape=jax.ShapeDtypeStruct((E, B), jnp.float32),
            in_specs=[pl.BlockSpec(memory_space=pltpu.MemorySpace.VMEM)] * 3,
            out_specs=pl.BlockSpec(memory_space=pltpu.MemorySpace.VMEM),
        )(weight_ed, bias_e1, x)
    else:
        # Large batch: tile the batch (lane) axis; weight/bias stay VMEM-resident.
        # Cap the tile at ~B/2 (128-aligned) so the parallel grid has >= 2 steps
        # and both v7x TensorCores are fed; harmless on single-TC v5e/v6e.
        tb = min(block_b, max(128, (B // 2 // 128) * 128))
        out_eb = pl.pallas_call(
            gating_kernel,
            out_shape=jax.ShapeDtypeStruct((E, B), jnp.float32),
            grid=(pl.cdiv(B, tb),),
            in_specs=[
                pl.BlockSpec((E, D), lambda i: (0, 0)),      # weight, resident
                pl.BlockSpec((E, 1), lambda i: (0, 0)),      # bias, resident
                pl.BlockSpec((tb, D), lambda i: (i, 0)),     # x in native [B, D]
            ],
            out_specs=pl.BlockSpec((E, tb), lambda i: (0, i)),
            compiler_params=pltpu.CompilerParams(
                dimension_semantics=("parallel",)),
        )(weight_ed, bias_e1, x)

    if transpose_output:
        return out_eb.T   # [B, E] — matches the PyTorch module's output layout
    return out_eb         # [E, B] — lane-dense, hand to the MoE dispatch consumer


if __name__ == "__main__":
    input_dim = 10
    num_experts = 3
    batch = 64

    key = jax.random.PRNGKey(0)
    kx, kw, kb = jax.random.split(key, 3)

    x = jax.random.normal(kx, (batch, input_dim), dtype=jnp.float32)
    # Deterministic init mimicking nn.Linear's uniform(-1/sqrt(fan_in), 1/sqrt(fan_in))
    bound = 1.0 / (input_dim ** 0.5)
    weight = jax.random.uniform(kw, (num_experts, input_dim), dtype=jnp.float32,
                                minval=-bound, maxval=bound)
    bias = jax.random.uniform(kb, (num_experts,), dtype=jnp.float32,
                              minval=-bound, maxval=bound)

    w_p, b_p = init_gating_params(weight, bias)   # done once, not per call

    out = jax.block_until_ready(gating_network(x, w_p, b_p))

    # Reference check (same semantics as the PyTorch module).
    ref = jax.nn.softmax(x @ weight.T + bias, axis=1)
    assert out.shape == (batch, num_experts)
    assert jnp.allclose(out, ref, atol=1e-5, rtol=1e-5)
    assert jnp.allclose(jnp.sum(out, axis=1), 1.0, atol=1e-5)

    # Exercise the batch-tiled ("parallel") grid path with a small tile.
    big_b = 512
    xb = jax.random.normal(kb, (big_b, input_dim), dtype=jnp.float32)
    out_big = jax.block_until_ready(gating_network(xb, w_p, b_p, block_b=128))
    ref_big = jax.nn.softmax(xb @ weight.T + bias, axis=1)
    assert out_big.shape == (big_b, num_experts)
    assert jnp.allclose(out_big, ref_big, atol=1e-5, rtol=1e-5)
    assert jnp.allclose(jnp.sum(out_big, axis=1), 1.0, atol=1e-5)

    print("KERNEL_OK")
</pallas_src>

<mosaic_0001>
module attributes {stable_mosaic.version = 11 : i64} {
  func.func @gating_kernel(%arg0: memref<3x10xf32, #tpu.memory_space<vmem>>, %arg1: memref<3x1xf32, #tpu.memory_space<vmem>>, %arg2: memref<64x10xf32, #tpu.memory_space<vmem>>, %arg3: memref<3x64xf32, #tpu.memory_space<vmem>>) attributes {dimension_semantics = [], scalar_prefetch = 0 : i64, scratch_operands = 0 : i64, tpu.core_type = #tpu.core_type<tc>} {
    %c0 = arith.constant 0 : index
    %c0_0 = arith.constant 0 : index
    %0 = vector.load %arg0[%c0, %c0_0] : memref<3x10xf32, #tpu.memory_space<vmem>>, vector<3x10xf32>
    %c0_1 = arith.constant 0 : index
    %c0_2 = arith.constant 0 : index
    %1 = vector.load %arg1[%c0_1, %c0_2] : memref<3x1xf32, #tpu.memory_space<vmem>>, vector<3x1xf32>
    %c0_3 = arith.constant 0 : index
    %c0_4 = arith.constant 0 : index
    %2 = vector.load %arg2[%c0_3, %c0_4] : memref<64x10xf32, #tpu.memory_space<vmem>>, vector<64x10xf32>
    %cst = arith.constant dense<0.000000e+00> : vector<3x64xf32>
    %3 = tpu.matmul %0, %2, %cst {dimension_numbers = #tpu.dot_dimension_numbers<[1], [1], [0], [0], [0, 0, 1, 0], [], []>} : vector<3x10xf32>, vector<64x10xf32>, vector<3x64xf32> -> vector<3x64xf32>
    %4 = vector.broadcast %1 : vector<3x1xf32> to vector<3x64xf32>
    %5 = arith.addf %3, %4 : vector<3x64xf32>
    %cst_5 = arith.constant dense<0xFF800000> : vector<64xf32>
    %6 = vector.multi_reduction <maximumf>, %5, %cst_5 [0] : vector<3x64xf32> to vector<64xf32>
    %7 = vector.shape_cast %6 : vector<64xf32> to vector<1x64xf32>
    %8 = vector.broadcast %7 : vector<1x64xf32> to vector<3x64xf32>
    %9 = arith.subf %5, %8 : vector<3x64xf32>
    %10 = math.exp %9 : vector<3x64xf32>
    %cst_6 = arith.constant dense<0.000000e+00> : vector<64xf32>
    %11 = vector.multi_reduction <add>, %10, %cst_6 [0] : vector<3x64xf32> to vector<64xf32>
    %12 = vector.shape_cast %11 : vector<64xf32> to vector<1x64xf32>
    %13 = vector.broadcast %12 : vector<1x64xf32> to vector<3x64xf32>
    %14 = arith.divf %10, %13 : vector<3x64xf32>
    %c0_7 = arith.constant 0 : index
    %c0_8 = arith.constant 0 : index
    %15 = vector.load %arg3[%c0_7, %c0_8] : memref<3x64xf32, #tpu.memory_space<vmem>>, vector<3x64xf32>
    tpu.vector_store %arg3[%c0_7, %c0_8], %14 {strides = array<i32>} : memref<3x64xf32, #tpu.memory_space<vmem>>, vector<3x64xf32>,
    return
  }
}

</mosaic_0001>

<bundles_post_ra>
// kernel: tpu_custom_call.1
= control target key start
LH: loop header
LB: loop body
LE: loop exit
PB: predicated region body
PF: predicated region fallthrough
CT: control target
= control target key end

     0   :  { %vm30_vm0 = vcmask 80896   ;;  %v170_v1 = vmov 0   ;;  %s237_s0 = inlined_call_operand.vmem [shape: f32[3,10], index: 0, kind: input, shape index: {}]   ;;  %s238_s1 = inlined_call_operand.vmem [shape: f32[3,1], index: 1, kind: input, shape index: {}]   ;;  %s239_s2 = inlined_call_operand.vmem [shape: f32[64,10], index: 2, kind: input, shape index: {}]   ;;  %s240_s3 = inlined_call_operand.hbm [shape: f32[3,64], index: 3, kind: output, shape index: {}]  }
   0x1   :  { %v24_v0 = vld [vmem:[%s239_s2 + $0x38] sm:$0xff]  ;;  %139 = vset.pattern.permute.xlu0 %v170_v1  ;;  %v23_v2 = vld [vmem:[%s239_s2 + $0x30] sm:$0xff]  ;;  %v16_v3 = vld [vmem:[%s238_s1] sm:$0x7] }
   0x2   :  { %128 = vmatpush.xpose.msk.msra.mxu0 %vm30_vm0, %v24_v0 }
   0x3   :  { %8 = vsyncpa [#allocation3], 0  ;;  %27 = vperm.xlu0 %139, %v16_v3   ;;  %v22_v4 = vld [vmem:[%s239_s2 + $0x28] sm:$0xff]  ;;  %v21_v5 = vld [vmem:[%s239_s2 + $0x20] sm:$0xff]  ;;  %vm78_vm1 = vcmask 518144   ;;  %s119_s6 = sshll.u32 %s240_s3, 4  ;;  %s120_s6 = int_to_ptr.hbm [resolvable:$true] %s119_s6 }
   0x4   :  { %v20_v6 = vld [vmem:[%s239_s2 + $0x18] sm:$0xff]  ;;  %v19_v7 = vld [vmem:[%s239_s2 + $0x10] sm:$0xff]  ;;  %v18_v8 = vld [vmem:[%s239_s2 + $0x8] sm:$0xff] }
   0x5   :  { %v17_v9 = vld [vmem:[%s239_s2] sm:$0xff] }
   0x6   :  { %129 = vmatpush.xpose.msk.msra.mxu0 %vm30_vm0, %v23_v2  ;;  %v15_v10 = vld [vmem:[%s237_s0] sm:$0x7]  ;;  %s171_s0 = smov [#allocation2]  }
   0x7   :  { %s117_s2 = sshll.u32 %s171_s0, 4  ;;  %s118_s2 = int_to_ptr.vmem [resolvable:$true] %s117_s2 }
   0xa   :  { %130 = vmatpush.xpose.msk.msra.mxu0 %vm30_vm0, %v22_v4 }
   0xe   :  { %131 = vmatpush.xpose.msk.msra.mxu0 %vm30_vm0, %v21_v5 }
  0x12   :  { %132 = vmatpush.xpose.msk.msra.mxu0 %vm30_vm0, %v20_v6 }
  0x16   :  { %133 = vmatpush.xpose.msk.msra.mxu0 %vm30_vm0, %v19_v7 }
  0x1a   :  { %134 = vmatpush.xpose.msk.msra.mxu0 %vm30_vm0, %v18_v8 }
  0x1e   :  { %135 = vmatpush.xpose.msk.msra.mxu0 %vm30_vm0, %v17_v9 }
  0x21   :  { %136 = vmatmul.msk.f32.vlgmr.msra.gmra.mxu0 %vm30_vm0, %v15_v10 }
  0x75   :  { %v28_v11 = vpop.permute.xlu0 %27 }
  0x9e   :  { %v75_v12 = vpop.f32.mrf.mxu0 }
  0x9f   :  { %v76_v13 = vadd.f32 %v75_v12, %v28_v11 }
  0xa1   :  { %v79_v14 = vsel %vm78_vm1, %v76_v13, -inf }
  0xa2   :  { %v80_v15 = vrot.slane %v79_v14, 4 }
  0xa4   :  { %v81_v16 = vmax.f32 %v79_v14, %v80_v15 }
  0xa6   :  { %v82_v17 = vrot.slane %v81_v16, 2 }
  0xa8   :  { %v83_v18 = vmax.f32 %v81_v16, %v82_v17 }
  0xaa   :  { %v84_v19 = vrot.slane %v83_v18, 1 }
  0xac   :  { %v85_v20 = vmax.f32 %v83_v18, %v84_v19 }
  0xae   :  { %v86_v21 = vsub.f32 %v76_v13, %v85_v20 }
  0xb0   :  { %v87_v22 = vmul.f32 1.442695, %v86_v21 }
  0xb2   :  { %140 = vpow2.f32 %v87_v22 }
  0xb8   :  { %v141_v23 = vpop.eup %140 }
  0xb9   :  { %v89_v24 = vsel %vm78_vm1, %v141_v23, 0.0 }
  0xba   :  { %v90_v25 = vrot.slane %v89_v24, 4 }
  0xbc   :  { %v91_v26 = vadd.f32 %v90_v25, %v89_v24 }
  0xbe   :  { %v92_v27 = vrot.slane %v91_v26, 2 }
  0xc0   :  { %v93_v28 = vadd.f32 %v92_v27, %v91_v26 }
  0xc2   :  { %v94_v29 = vrot.slane %v93_v28, 1 }
  0xc4   :  { %v95_v30 = vadd.f32 %v94_v29, %v93_v28 }
  0xc6   :  { %142 = vrcp.f32 %v95_v30  ;;  %v107_v34 = vand.u32 2147483648, %v95_v30  ;;  %v105_v36 = vand.u32 2147483647, %v95_v30  ;;  %vm101_vm3 = vweird.f32 %v95_v30 }
  0xc8   :  { %v108_v38 = vor.u32 1.1754944e-38, %v107_v34  ;;  %vm106_vm5 = vcmp.eq.f32.partialorder %v105_v36, 8.507059e+37 }
  0xcc   :  { %v143_v31 = vpop.eup %142 }
  0xcd   :  { %v97_v32 = vmul.f32 %v143_v31, %v95_v30  ;;  %vm102_vm2 = vweird.f32 %v143_v31 }
  0xce   :  { %vm103_vm4 = vmor %vm101_vm3, %vm102_vm2 }
  0xcf   :  { %v98_v33 = vsub.f32 1.0, %v97_v32 }
  0xd1   :  { %v99_v35 = vmul.f32 %v143_v31, %v98_v33 }
  0xd3   :  { %v100_v37 = vadd.f32 %v143_v31, %v99_v35 }
  0xd5   :  { %v104_v39 = vsel %vm103_vm4, %v143_v31, %v100_v37 }
  0xd6   :  { %v109_v40 = vsel %vm106_vm5, %v108_v38, %v104_v39 }
  0xd7   :  { %v110_v41 = vmul.f32 %v141_v23, %v109_v40 }
  0xd9   :  { %111 = vst.msk [vmem:[#allocation2] sm:$0x7] %vm78_vm1, %v110_v41 }
  0xda   :  { %122 = dma.vmem_to_hbm [thread:$0]  %s118_s2, 64, %s120_s6, [#allocation3]  }
  0xdb   :  { %168 = dma.done.wait [#allocation3], 64  }
  0xdc   :  { %169 = vsyncadd [#allocation3], 4294967232 }
  0xdd   :  { %127 = vsyncpa [#allocation3], 1 }

</bundles_post_ra>
